<compile_context>
chip_gen: v7x
topology: tpu7x:2x2x1
jax: 0.10.0
libtpu: 0.0.40
codegen_flags: <defaults>
</compile_context>

<pallas_src>
import functools

import jax
import jax.numpy as jnp
from jax import lax
from jax.experimental import pallas as pl
from jax.experimental.pallas import tpu as pltpu

INPUT_DIM = 2
HIDDEN_DIM = 25
OUTPUT_DIM = 2
BN_EPS = 1e-5

# Weight-slab row layout (sublane-aligned starts; weights stored FEATURE-MAJOR, i.e.
# pre-transposed to (out_features, in_features) so kernels compute W @ X directly).
W2_ROW = 0        # rows [0, 25)   : w2^T (25, 25)
W1_ROW = 32       # rows [32, 57)  : w1^T (25, 2)  in cols [0, 2)
W3_ROW = 64       # rows [64, 66)  : w3^T (2, 25)
W_ROWS = 72       # padded to a multiple of 8 sublanes

# Vector slab: per-feature COLUMNS (feature-major broadcast is along lanes).
# col 0: gamma1, col 1: beta1, col 2: gamma2, col 3: beta2, col 4: b3 (rows [0,2)).
V_COLS = 8

# Batch-tile width (lanes).  1-4K range amortizes per-grid-step overhead while keeping
# per-tile VMEM use ~1 MiB (safe under v5e 16 MiB / v7x 32 MiB scoped defaults).
TILE_MAX = 2048


def _round_up(n, m):
    return ((n + m - 1) // m) * m


# ----------------------------- in-kernel helpers ------------------------------------

def _w1t(w_ref):
    return w_ref[W1_ROW:W1_ROW + HIDDEN_DIM, :INPUT_DIM]       # (25, 2)


def _w2t(w_ref):
    return w_ref[W2_ROW:W2_ROW + HIDDEN_DIM, :]                # (25, 25)


def _w3t(w_ref):
    return w_ref[W3_ROW:W3_ROW + OUTPUT_DIM, :]                # (2, 25)


def _bn_scale_shift(stats_ref, gamma, beta, inv_n):
    """Training-mode BN folded to per-feature scale/shift from (sum, sumsq) stats.

    All math here is on tiny (H, 1) vectors; only one mul + one add (plus the ReLU max)
    touch the full (H, TILE) activation tensor afterwards.
    """
    mu = stats_ref[:, 0:1] * inv_n                                       # (H, 1)
    var = jnp.maximum(stats_ref[:, 1:2] * inv_n - mu * mu, 0.0)          # (H, 1)
    sc = gamma * lax.rsqrt(var + BN_EPS)                                 # EUP rsqrt
    sh = beta - mu * sc
    return sc, sh


# ----------------------------- kernels ----------------------------------------------

def _stats1_kernel(x_ref, w_ref, s1_ref):
    """Pass 1: accumulate per-feature sum / sum-of-squares of h1 = w1^T @ x."""
    @pl.when(pl.program_id(0) == 0)
    def _():
        s1_ref[...] = jnp.zeros_like(s1_ref)

    h1 = jnp.dot(_w1t(w_ref), x_ref[...], preferred_element_type=jnp.float32)  # (H, T)
    # Zero-padded batch columns contribute exactly 0 (x pads are zero, bias dropped).
    s1_ref[:, 0:1] += jnp.sum(h1, axis=1, keepdims=True)
    s1_ref[:, 1:2] += jnp.sum(h1 * h1, axis=1, keepdims=True)


def _stats2_kernel(x_ref, w_ref, v_ref, s1_ref, s2_ref, *,
                   inv_n, tile, batch, mask_tail):
    """Pass 2: accumulate stats of h2 = w2^T @ relu(bn1(h1)) across batch tiles."""
    @pl.when(pl.program_id(0) == 0)
    def _():
        s2_ref[...] = jnp.zeros_like(s2_ref)

    sc1, sh1 = _bn_scale_shift(s1_ref, v_ref[:, 0:1], v_ref[:, 1:2], inv_n)
    h1 = jnp.dot(_w1t(w_ref), x_ref[...], preferred_element_type=jnp.float32)
    a1 = jnp.maximum(h1 * sc1 + sh1, 0.0)                                # (H, T)
    if mask_tail:
        # Padded batch columns are no longer zero after the BN shift: mask them so they
        # do not pollute the h2 statistics.
        lane = lax.broadcasted_iota(jnp.int32, (1, tile), 1)
        col = pl.program_id(0) * tile + lane
        a1 = jnp.where(col < batch, a1, 0.0)
    h2 = jnp.dot(_w2t(w_ref), a1, preferred_element_type=jnp.float32)    # (H, T)
    s2_ref[:, 0:1] += jnp.sum(h2, axis=1, keepdims=True)
    s2_ref[:, 1:2] += jnp.sum(h2 * h2, axis=1, keepdims=True)


def _apply_kernel(x_ref, w_ref, v_ref, s1_ref, s2_ref, o_ref, *, inv_n):
    """Pass 3: full forward per batch tile using the whole-batch BN statistics."""
    sc1, sh1 = _bn_scale_shift(s1_ref, v_ref[:, 0:1], v_ref[:, 1:2], inv_n)
    sc2, sh2 = _bn_scale_shift(s2_ref, v_ref[:, 2:3], v_ref[:, 3:4], inv_n)
    b3 = v_ref[:OUTPUT_DIM, 4:5]                                         # (2, 1)

    h1 = jnp.dot(_w1t(w_ref), x_ref[...], preferred_element_type=jnp.float32)
    a1 = jnp.maximum(h1 * sc1 + sh1, 0.0)
    h2 = jnp.dot(_w2t(w_ref), a1, preferred_element_type=jnp.float32)
    a2 = jnp.maximum(h2 * sc2 + sh2, 0.0)
    out = jnp.dot(_w3t(w_ref), a2, preferred_element_type=jnp.float32) + b3
    o_ref[...] = out.astype(o_ref.dtype)                                 # lane-dense (2, T)


# ----------------------------- host-side packing & wrapper --------------------------

def pack_params(params):
    """Pack all parameters into two small VMEM slabs (once, outside the kernels).

    NOTE: fc1/fc2 biases are dropped because training-mode BatchNorm subtracts them
    back out exactly.  Do NOT reuse this packing for eval-mode (running-stats) BN.
    """
    (w1, b1, g1, be1, w2, b2, g2, be2, w3, b3) = params
    del b1, b2

    w_slab = jnp.zeros((W_ROWS, HIDDEN_DIM), jnp.float32)
    w_slab = w_slab.at[W2_ROW:W2_ROW + HIDDEN_DIM, :].set(w2.T)
    w_slab = w_slab.at[W1_ROW:W1_ROW + HIDDEN_DIM, :INPUT_DIM].set(w1.T)
    w_slab = w_slab.at[W3_ROW:W3_ROW + OUTPUT_DIM, :].set(w3.T)

    v_slab = jnp.zeros((HIDDEN_DIM, V_COLS), jnp.float32)
    v_slab = v_slab.at[:, 0].set(g1[0])
    v_slab = v_slab.at[:, 1].set(be1[0])
    v_slab = v_slab.at[:, 2].set(g2[0])
    v_slab = v_slab.at[:, 3].set(be2[0])
    v_slab = v_slab.at[:OUTPUT_DIM, 4].set(b3[0])
    return w_slab, v_slab


def naive_net_forward(x, params, *, tile_max=TILE_MAX):
    w_slab, v_slab = pack_params(params)
    batch = x.shape[0]

    tile = min(tile_max, _round_up(batch, 128))
    b_pad = _round_up(batch, tile)
    num_tiles = b_pad // tile
    inv_n = 1.0 / float(batch)
    mask_tail = b_pad != batch

    # Feature-major, lane-dense layout: batch lives on the 128-lane axis.
    x_t = jnp.zeros((INPUT_DIM, b_pad), jnp.float32)
    x_t = x_t.at[:, :batch].set(x.T.astype(jnp.float32))

    x_spec = pl.BlockSpec((INPUT_DIM, tile), lambda i: (0, i))
    w_spec = pl.BlockSpec((W_ROWS, HIDDEN_DIM), lambda i: (0, 0))
    v_spec = pl.BlockSpec((HIDDEN_DIM, V_COLS), lambda i: (0, 0))
    s_spec = pl.BlockSpec((HIDDEN_DIM, 2), lambda i: (0, 0))
    stats_shape = jax.ShapeDtypeStruct((HIDDEN_DIM, 2), jnp.float32)

    reduce_cp = pltpu.CompilerParams(dimension_semantics=("arbitrary",))
    parallel_cp = pltpu.CompilerParams(dimension_semantics=("parallel",))

    # Pass 1: whole-batch stats of h1 (reduction over batch tiles -> "arbitrary").
    s1 = pl.pallas_call(
        _stats1_kernel,
        out_shape=stats_shape,
        grid=(num_tiles,),
        in_specs=[x_spec, w_spec],
        out_specs=s_spec,
        compiler_params=reduce_cp,
    )(x_t, w_slab)

    # Pass 2: whole-batch stats of h2 (needs bn1; reduction -> "arbitrary").
    s2 = pl.pallas_call(
        functools.partial(_stats2_kernel, inv_n=inv_n, tile=tile,
                          batch=batch, mask_tail=mask_tail),
        out_shape=stats_shape,
        grid=(num_tiles,),
        in_specs=[x_spec, w_spec, v_spec, s_spec],
        out_specs=s_spec,
        compiler_params=reduce_cp,
    )(x_t, w_slab, v_slab, s1)

    # Pass 3: per-tile independent apply (batch axis "parallel" -> v7x megacore).
    out_t = pl.pallas_call(
        functools.partial(_apply_kernel, inv_n=inv_n),
        out_shape=jax.ShapeDtypeStruct((OUTPUT_DIM, b_pad), jnp.float32),
        grid=(num_tiles,),
        in_specs=[x_spec, w_spec, v_spec, s_spec, s_spec],
        out_specs=pl.BlockSpec((OUTPUT_DIM, tile), lambda i: (0, i)),
        compiler_params=parallel_cp,
    )(x_t, w_slab, v_slab, s1, s2)

    # Layout plumbing only: back to (batch, OUTPUT_DIM) row-major.
    return out_t[:, :batch].T


# ----------------------------- init & pure-JAX reference ----------------------------

def init_params(key):
    """Deterministic init mimicking PyTorch defaults (uniform +/- 1/sqrt(fan_in))."""
    ks = jax.random.split(key, 6)

    def linear(kw, kb, fan_in, fan_out):
        bound = 1.0 / jnp.sqrt(fan_in)
        # stored as (in, out) — i.e. transpose of PyTorch's (out, in) weight
        w = jax.random.uniform(kw, (fan_in, fan_out), jnp.float32, -bound, bound)
        b = jax.random.uniform(kb, (1, fan_out), jnp.float32, -bound, bound)
        return w, b

    w1, b1 = linear(ks[0], ks[1], INPUT_DIM, HIDDEN_DIM)
    w2, b2 = linear(ks[2], ks[3], HIDDEN_DIM, HIDDEN_DIM)
    w3, b3 = linear(ks[4], ks[5], HIDDEN_DIM, OUTPUT_DIM)
    g1 = jnp.ones((1, HIDDEN_DIM), jnp.float32)
    be1 = jnp.zeros((1, HIDDEN_DIM), jnp.float32)
    g2 = jnp.ones((1, HIDDEN_DIM), jnp.float32)
    be2 = jnp.zeros((1, HIDDEN_DIM), jnp.float32)
    return (w1, b1, g1, be1, w2, b2, g2, be2, w3, b3)


def naive_net_reference(x, params):
    """Pure-JAX reference with full PyTorch semantics (biases + two-pass variance BN)."""
    (w1, b1, g1, be1, w2, b2, g2, be2, w3, b3) = params

    def bn(h, gamma, beta):
        mu = jnp.mean(h, axis=0, keepdims=True)
        var = jnp.mean((h - mu) ** 2, axis=0, keepdims=True)
        return (h - mu) * lax.rsqrt(var + BN_EPS) * gamma + beta

    h = x @ w1 + b1
    h = jnp.maximum(bn(h, g1, be1), 0.0)
    h = h @ w2 + b2
    h = jnp.maximum(bn(h, g2, be2), 0.0)
    return h @ w3 + b3


if __name__ == "__main__":
    key = jax.random.PRNGKey(0)
    k_x, k_p, k_x2 = jax.random.split(key, 3)
    params = init_params(k_p)

    # Small-shape run (single tile).
    batch = 8
    x = jax.random.normal(k_x, (batch, INPUT_DIM), dtype=jnp.float32)
    out = jax.block_until_ready(naive_net_forward(x, params))
    ref = naive_net_reference(x, params)
    assert out.shape == (batch, OUTPUT_DIM)
    assert jnp.allclose(out, ref, atol=1e-4, rtol=1e-4)

    # Multi-tile run exercising the grid-safe BN accumulation and tail masking.
    batch2 = 300
    x2 = jax.random.normal(k_x2, (batch2, INPUT_DIM), dtype=jnp.float32)
    out2 = jax.block_until_ready(naive_net_forward(x2, params, tile_max=128))
    ref2 = naive_net_reference(x2, params)
    assert out2.shape == (batch2, OUTPUT_DIM)
    assert jnp.allclose(out2, ref2, atol=1e-4, rtol=1e-4)

    print("KERNEL_OK")
</pallas_src>

<mosaic_0001>
module attributes {stable_mosaic.version = 11 : i64} {
  func.func @_stats1_kernel(%arg0: i32, %arg1: memref<2x128xf32, #tpu.memory_space<vmem>>, %arg2: memref<72x25xf32, #tpu.memory_space<vmem>>, %arg3: memref<25x2xf32, #tpu.memory_space<vmem>>) attributes {dimension_semantics = [#tpu.dimension_semantics<arbitrary>], iteration_bounds = array<i64: 1>, scalar_prefetch = 0 : i64, scratch_operands = 0 : i64, tpu.core_type = #tpu.core_type<tc>, window_params = [{transform_indices = @transform_0, window_bounds = array<i64: 2, 128>}, {pipeline_mode = #tpu.pipeline_mode<synchronous>, transform_indices = @transform_1, window_bounds = array<i64: 72, 25>}, {pipeline_mode = #tpu.pipeline_mode<synchronous>, transform_indices = @transform_2, window_bounds = array<i64: 25, 2>}]} {
    %c0_i32 = arith.constant 0 : i32
    %0 = arith.cmpi eq, %arg0, %c0_i32 : i32
    %1 = arith.extui %0 : i1 to i32
    %c0_i32_0 = arith.constant 0 : i32
    %2 = arith.cmpi ne, %1, %c0_i32_0 : i32
    scf.if %2 {
      %cst_12 = arith.constant 0.000000e+00 : f32
      %17 = vector.broadcast %cst_12 : f32 to vector<25x2xf32>
      %c0_13 = arith.constant 0 : index
      %c0_14 = arith.constant 0 : index
      %18 = vector.load %arg3[%c0_13, %c0_14] : memref<25x2xf32, #tpu.memory_space<vmem>>, vector<25x2xf32>
      tpu.vector_store %arg3[%c0_13, %c0_14], %17 {strides = array<i32>} : memref<25x2xf32, #tpu.memory_space<vmem>>, vector<25x2xf32>,
    } else {
    }
    %c32 = arith.constant 32 : index
    %c0 = arith.constant 0 : index
    %3 = vector.load %arg2[%c32, %c0] : memref<72x25xf32, #tpu.memory_space<vmem>>, vector<25x2xf32>
    %c0_1 = arith.constant 0 : index
    %c0_2 = arith.constant 0 : index
    %4 = vector.load %arg1[%c0_1, %c0_2] : memref<2x128xf32, #tpu.memory_space<vmem>>, vector<2x128xf32>
    %cst = arith.constant dense<0.000000e+00> : vector<25x128xf32>
    %5 = tpu.matmul %3, %4, %cst {dimension_numbers = #tpu.dot_dimension_numbers<[1], [0], [0], [1], [0, 0, 1, 1], [], []>} : vector<25x2xf32>, vector<2x128xf32>, vector<25x128xf32> -> vector<25x128xf32>
    %c0_3 = arith.constant 0 : index
    %c0_4 = arith.constant 0 : index
    %6 = vector.load %arg3[%c0_3, %c0_4] : memref<25x2xf32, #tpu.memory_space<vmem>>, vector<25x1xf32>
    %cst_5 = arith.constant dense<0.000000e+00> : vector<25xf32>
    %7 = vector.multi_reduction <add>, %5, %cst_5 [1] : vector<25x128xf32> to vector<25xf32>
    %8 = vector.shape_cast %7 : vector<25xf32> to vector<25x1xf32>
    %9 = arith.addf %6, %8 : vector<25x1xf32>
    %c0_6 = arith.constant 0 : index
    %c0_7 = arith.constant 0 : index
    %10 = vector.load %arg3[%c0_6, %c0_7] : memref<25x2xf32, #tpu.memory_space<vmem>>, vector<25x1xf32>
    tpu.vector_store %arg3[%c0_6, %c0_7], %9 {strides = array<i32>} : memref<25x2xf32, #tpu.memory_space<vmem>>, vector<25x1xf32>,
    %c0_8 = arith.constant 0 : index
    %c1 = arith.constant 1 : index
    %11 = vector.load %arg3[%c0_8, %c1] : memref<25x2xf32, #tpu.memory_space<vmem>>, vector<25x1xf32>
    %12 = arith.mulf %5, %5 : vector<25x128xf32>
    %cst_9 = arith.constant dense<0.000000e+00> : vector<25xf32>
    %13 = vector.multi_reduction <add>, %12, %cst_9 [1] : vector<25x128xf32> to vector<25xf32>
    %14 = vector.shape_cast %13 : vector<25xf32> to vector<25x1xf32>
    %15 = arith.addf %11, %14 : vector<25x1xf32>
    %c0_10 = arith.constant 0 : index
    %c1_11 = arith.constant 1 : index
    %16 = vector.load %arg3[%c0_10, %c1_11] : memref<25x2xf32, #tpu.memory_space<vmem>>, vector<25x1xf32>
    tpu.vector_store %arg3[%c0_10, %c1_11], %15 {strides = array<i32>} : memref<25x2xf32, #tpu.memory_space<vmem>>, vector<25x1xf32>,
    return
  }
  func.func @transform_0(%arg0: i32) -> (i32, i32) {
    %c0_i32 = arith.constant 0 : i32
    %c0_i32_0 = arith.constant 0 : i32
    return %c0_i32, %arg0 : i32, i32
  }
  func.func @transform_1(%arg0: i32) -> (i32, i32) {
    %c0_i32 = arith.constant 0 : i32
    %c0_i32_0 = arith.constant 0 : i32
    %c0_i32_1 = arith.constant 0 : i32
    return %c0_i32, %c0_i32_0 : i32, i32
  }
  func.func @transform_2(%arg0: i32) -> (i32, i32) {
    %c0_i32 = arith.constant 0 : i32
    %c0_i32_0 = arith.constant 0 : i32
    %c0_i32_1 = arith.constant 0 : i32
    return %c0_i32, %c0_i32_0 : i32, i32
  }
}

</mosaic_0001>

<bundles_post_ra>
// kernel: tpu_custom_call.1
= control target key start
LH: loop header
LB: loop body
LE: loop exit
PB: predicated region body
PF: predicated region fallthrough
CT: control target
= control target key end

     0   :  { %vm39_vm0 = vcmask 1041408   ;;  %vm15_vm1 = vcmask 15360   ;;  %v204_v5 = vmov 0.0   ;;  %vm138_vm2 = vcmask 1040384   ;;  %s302_s0 = inlined_call_operand.vmem [shape: f32[2,128], index: 0, kind: input, shape index: {}]   ;;  %s303_s1 = inlined_call_operand.vmem [shape: f32[72,25], index: 1, kind: input, shape index: {}]   ;;  %s304_s2 = inlined_call_operand.vmem [shape: f32[25,2], index: 2, kind: output, shape index: {}]  }
   0x1   :  { %v25_v0 = vld [vmem:[%s302_s0] sm:$0x3]  ;;  %v23_v2 = vld [vmem:[%s303_s1 + $0x30] sm:$0xff]  ;;  %v22_v3 = vld [vmem:[%s303_s1 + $0x28] sm:$0xff]  ;;  %18 = vst.msk [vmem:[%s304_s2 + $0x10] sm:$0xff] %vm15_vm1, %v204_v5  ;;  %vm19_vm3 = vcmask 8192  }
   0x2   :  { %v21_v1 = vld [vmem:[%s303_s1 + $0x20] sm:$0xff]  ;;  %193 = vmatprep.subr.msk.mxu0 %vm39_vm0, %v25_v0  ;;  %201 = vmatprep.subr.msk.mxu1 %vm39_vm0, %v25_v0  ;;  %v24_v4 = vld [vmem:[%s303_s1 + $0x38] sm:$0x1]  ;;  %16 = vst.msk [vmem:[%s304_s2] sm:$0xff] %vm15_vm1, %v204_v5  ;;  %17 = vst.msk [vmem:[%s304_s2 + $0x8] sm:$0xff] %vm15_vm1, %v204_v5  ;;  %vm146_vm4 = vcmask 7168  }
   0x3   :  { %194 = vmatpush3.msk.msra.mxu0 %vm39_vm0, %v25_v0  ;;  %202 = vmatpush3.msk.msra.mxu1 %vm39_vm0, %v25_v0  ;;  %20 = vst.msk [vmem:[%s304_s2 + $0x18] sm:$0x1] %vm19_vm3, %v204_v5  ;;  %vm150_vm5 = vcmask 0   ;;  %vm173_vm6 = vcmask 15368   ;;  %vm177_vm7 = vcmask 8200  }
   0x4   :  { %195 = vmatprep.mubr.msk.f32.mxu0 %vm15_vm1, %v21_v1  ;;  %198 = vmatprep.mubr.msk.f32.mxu1 %vm15_vm1, %v23_v2 }
   0x5   :  { %196 = vmatmul.mubr.msk.f32.vlgmr.msra.gmra.mrb[0].mxu0 %vm15_vm1, %v22_v3  ;;  %199 = vmatmul.mubr.msk.f32.vlgmr.msra.gmra.mrb[0].mxu1 %vm15_vm1, %v24_v4 }
   0x8   :  { %v130_v16 = vld [vmem:[%s304_s2 + $0x10] sm:$0xff] }
   0x9   :  { %v128_v17 = vld [vmem:[%s304_s2] sm:$0xff]  ;;  %v129_v23 = vld [vmem:[%s304_s2 + $0x8] sm:$0xff] }
   0xa   :  { %v131_v22 = vld [vmem:[%s304_s2 + $0x18] sm:$0x1] }
  0xd8   :  { %v197_v6 = vpop.f32.mrb[0].mxu0  ;;  %v200_v7 = vpop.f32.mrb[0].mxu1 }
  0xd9   :  { %v109_v8 = vpop.f32.mrb[1].mxu0  ;;  %v119_v9 = vpop.f32.mrb[1].mxu1  ;;  %v139_v10 = vsel %vm138_vm2, %v200_v7, 0.0  ;;  %v157_v12 = vmul.f32 %v197_v6, %v197_v6  ;;  %v159_v13 = vmul.f32 %v200_v7, %v200_v7 }
  0xda   :  { %136 = vadd.xlane.f32.xlu1 %v119_v9  ;;  %132 = vadd.xlane.f32.xlu0 %v109_v8  ;;  %v156_v11 = vmul.f32 %v109_v8, %v109_v8  ;;  %v158_v14 = vmul.f32 %v119_v9, %v119_v9 }
  0xdb   :  { %v166_v15 = vsel %vm138_vm2, %v159_v13, 0.0 }
  0xde   :  { %140 = vadd.xlane.f32.xlu1 %v139_v10  ;;  %134 = vadd.xlane.f32.xlu0 %v197_v6 }
  0xe2   :  { %162 = vadd.xlane.f32.xlu1 %v157_v12  ;;  %160 = vadd.xlane.f32.xlu0 %v156_v11 }
  0xe6   :  { %167 = vadd.xlane.f32.xlu1 %v166_v15  ;;  %164 = vadd.xlane.f32.xlu0 %v158_v14 }
 0x167   :  { %v137_v18 = vpop.xlane.xlu1 %136  ;;  %v133_v19 = vpop.xlane.xlu0 %132 }
 0x168   :  { %v144_v20 = vadd.f32 %v137_v18, %v130_v16  ;;  %v142_v21 = vadd.f32 %v133_v19, %v128_v17 }
 0x16a   :  { %149 = vst.msk [vmem:[%s304_s2 + $0x10] sm:$0xff] %vm146_vm4, %v144_v20  ;;  %147 = vst.msk [vmem:[%s304_s2] sm:$0xff] %vm146_vm4, %v142_v21 }
 0x16b   :  { %v141_v24 = vpop.xlane.xlu1 %140  ;;  %v135_v25 = vpop.xlane.xlu0 %134 }
 0x16c   :  { %v145_v26 = vadd.f32 %v141_v24, %v131_v22  ;;  %v143_v27 = vadd.f32 %v135_v25, %v129_v23 }
 0x16e   :  { %151 = vst.msk [vmem:[%s304_s2 + $0x18] sm:$0x1] %vm150_vm5, %v145_v26 }
 0x16f   :  { %148 = vst.msk [vmem:[%s304_s2 + $0x8] sm:$0xff] %vm146_vm4, %v143_v27  ;;  %v163_v28 = vpop.xlane.xlu1 %162  ;;  %v161_v29 = vpop.xlane.xlu0 %160 }
 0x171   :  { %v152_v30 = vld [vmem:[%s304_s2] sm:$0xff]  ;;  %v154_v32 = vld [vmem:[%s304_s2 + $0x10] sm:$0xff] }
 0x172   :  { %v169_v31 = vadd.f32 %v161_v29, %v152_v30 }
 0x173   :  { %v165_v33 = vpop.xlane.xlu0 %164  ;;  %v168_v37 = vpop.xlane.xlu1 %167 }
 0x174   :  { %174 = vst.msk [vmem:[%s304_s2] sm:$0xff] %vm173_vm6, %v169_v31  ;;  %v171_v34 = vadd.f32 %v165_v33, %v154_v32 }
 0x175   :  { %v155_v36 = vld [vmem:[%s304_s2 + $0x18] sm:$0x1] }
 0x176   :  { %v153_v35 = vld [vmem:[%s304_s2 + $0x8] sm:$0xff]  ;;  %v172_v39 = vadd.f32 %v168_v37, %v155_v36  ;;  %176 = vst.msk [vmem:[%s304_s2 + $0x10] sm:$0xff] %vm173_vm6, %v171_v34 }
 0x177   :  { %v170_v38 = vadd.f32 %v163_v28, %v153_v35 }
 0x178   :  { %178 = vst.msk [vmem:[%s304_s2 + $0x18] sm:$0x1] %vm177_vm7, %v172_v39 }
 0x179   :  { %175 = vst.msk [vmem:[%s304_s2 + $0x8] sm:$0xff] %vm173_vm6, %v170_v38 }

</bundles_post_ra>
